<compile_context>
chip_gen: v6e
topology: v6e:2x2x1
jax: 0.10.0
libtpu: 0.0.40
codegen_flags: <defaults>
</compile_context>

<pallas_src>
import functools

import jax
import jax.numpy as jnp
from jax.experimental import pallas as pl
from jax.experimental.pallas import tpu as pltpu


# ----------------------------- kernel bodies -----------------------------

def _twin_body(x_ref, act_ref, w1_ref, b1_ref, w2_ref, b2_ref, w3_ref, b3_ref,
               out_ref):
    """Both twin networks, 3 fused matmuls total, for one batch tile."""
    wdt = w1_ref.dtype                                    # bf16 MXU operand dtype

    # ---- Layer 1: one dot against packed [W1_a | W1_b] (Din, 2*H1) ----
    if act_ref is not None:
        xin = jnp.concatenate([x_ref[...], act_ref[...]], axis=-1)
    else:
        xin = x_ref[...]
    h1 = jnp.dot(xin.astype(wdt), w1_ref[...],
                 preferred_element_type=jnp.float32)
    h1 = jnp.maximum(h1 + b1_ref[...], 0.0)               # f32 (TB, 2*H1)

    # ---- Layer 2: one dot against block-diagonal W2 (2*H1, 2*H2) ----
    h2 = jnp.dot(h1.astype(wdt), w2_ref[...],
                 preferred_element_type=jnp.float32)
    h2 = jnp.maximum(h2 + b2_ref[...], 0.0)               # f32 (TB, 2*H2)

    # ---- Layer 3: one dot against block-diagonal W3 (2*H2, 2*Dout) ----
    out = jnp.dot(h2.astype(wdt), w3_ref[...],
                  preferred_element_type=jnp.float32) + b3_ref[...]
    out_ref[...] = out.astype(out_ref.dtype)              # lane-packed (TB, 2*Dout)


def _twin_kernel_with_action(x_ref, act_ref, w1_ref, b1_ref, w2_ref, b2_ref,
                             w3_ref, b3_ref, out_ref):
    _twin_body(x_ref, act_ref, w1_ref, b1_ref, w2_ref, b2_ref, w3_ref, b3_ref,
               out_ref)


def _twin_kernel_no_action(x_ref, w1_ref, b1_ref, w2_ref, b2_ref, w3_ref,
                           b3_ref, out_ref):
    _twin_body(x_ref, None, w1_ref, b1_ref, w2_ref, b2_ref, w3_ref, b3_ref,
               out_ref)


# ------------------------------- wrapper ---------------------------------

def _batch_tile(B: int) -> int:
    """Batch tile: full array for tiny B, otherwise a multiple of 8, <=128."""
    if B <= 8:
        return B
    return min(128, (B // 8) * 8)


def twin_forward(x, action, params):
    """Run both twin networks in a single pallas_call.

    Args:
      x:       (B, input_size) float32
      action:  (B, cat_size) float32 or None
      params:  packed params from init_twin_params()[1].
    Returns:
      (a_out, b_out), each (B, Dout) float32.
    """
    x = x.astype(jnp.float32)
    B = x.shape[0]
    input_size = params["input_size"]
    cat_size = params["cat_size"]
    Din, H1x2 = params["w1"].shape
    H2x2 = params["w2"].shape[1]
    Doutx2 = params["w3"].shape[1]
    Dout = Doutx2 // 2

    if cat_size > 0 and action is None:
        raise ValueError("params were built with cat_size > 0; action is required")
    if cat_size == 0 and action is not None:
        raise ValueError("params were built with cat_size == 0; got an action")
    assert x.shape[1] == input_size

    TB = _batch_tile(B)
    n_tiles = pl.cdiv(B, TB)

    batch_spec = lambda i: (i, 0)      # streams with the batch grid axis
    fixed_spec = lambda i: (0, 0)      # batch-invariant -> weights stay VMEM-resident

    if cat_size > 0:
        action = action.astype(jnp.float32)
        inputs = (x, action, params["w1"], params["b1"], params["w2"],
                  params["b2"], params["w3"], params["b3"])
        in_specs = [
            pl.BlockSpec((TB, input_size), batch_spec),
            pl.BlockSpec((TB, cat_size), batch_spec),
            pl.BlockSpec((Din, H1x2), fixed_spec),
            pl.BlockSpec((1, H1x2), fixed_spec),
            pl.BlockSpec((H1x2, H2x2), fixed_spec),
            pl.BlockSpec((1, H2x2), fixed_spec),
            pl.BlockSpec((H2x2, Doutx2), fixed_spec),
            pl.BlockSpec((1, Doutx2), fixed_spec),
        ]
        kernel = _twin_kernel_with_action
    else:
        inputs = (x, params["w1"], params["b1"], params["w2"], params["b2"],
                  params["w3"], params["b3"])
        in_specs = [
            pl.BlockSpec((TB, input_size), batch_spec),
            pl.BlockSpec((Din, H1x2), fixed_spec),
            pl.BlockSpec((1, H1x2), fixed_spec),
            pl.BlockSpec((H1x2, H2x2), fixed_spec),
            pl.BlockSpec((1, H2x2), fixed_spec),
            pl.BlockSpec((H2x2, Doutx2), fixed_spec),
            pl.BlockSpec((1, Doutx2), fixed_spec),
        ]
        kernel = _twin_kernel_no_action

    flops = (2 * B * Din * H1x2          # layer 1 (both twins, one dot)
             + 2 * B * H1x2 * H2x2       # layer 2 (block-diagonal)
             + 2 * B * H2x2 * Doutx2)    # layer 3 (block-diagonal)
    bytes_accessed = sum(int(a.size) * a.dtype.itemsize for a in inputs)
    bytes_accessed += B * Doutx2 * 4     # output

    out = pl.pallas_call(
        kernel,
        out_shape=jax.ShapeDtypeStruct((B, Doutx2), jnp.float32),
        grid=(n_tiles,),
        in_specs=in_specs,
        out_specs=pl.BlockSpec((TB, Doutx2), batch_spec),
        compiler_params=pltpu.CompilerParams(
            dimension_semantics=("parallel",)),
        cost_estimate=pl.CostEstimate(flops=flops, transcendentals=0,
                                      bytes_accessed=bytes_accessed),
    )(*inputs)

    return out[:, :Dout], out[:, Dout:]


# --------------------------- parameter handling ---------------------------

def pack_twin_params(raw, input_size, cat_size):
    """Pack per-twin f32 params into the fused bf16 layout the kernel uses."""
    H1 = raw["w1_a"].shape[1]
    H2 = raw["w2_a"].shape[1]
    Dout = raw["w3_a"].shape[1]

    # Layer 1: per-twin weights concatenated along the OUTPUT dim.
    w1 = jnp.concatenate([raw["w1_a"], raw["w1_b"]], axis=1)          # (Din, 2H1)
    b1 = jnp.concatenate([raw["b1_a"], raw["b1_b"]])[None, :]         # (1, 2H1)

    # Layer 2: block-diagonal so one dot does both twins.
    w2 = jnp.zeros((2 * H1, 2 * H2), jnp.float32)
    w2 = w2.at[:H1, :H2].set(raw["w2_a"]).at[H1:, H2:].set(raw["w2_b"])
    b2 = jnp.concatenate([raw["b2_a"], raw["b2_b"]])[None, :]         # (1, 2H2)

    # Layer 3: block-diagonal; result is the lane-packed output slab.
    w3 = jnp.zeros((2 * H2, 2 * Dout), jnp.float32)
    w3 = w3.at[:H2, :Dout].set(raw["w3_a"]).at[H2:, Dout:].set(raw["w3_b"])
    b3 = jnp.concatenate([raw["b3_a"], raw["b3_b"]])[None, :]         # (1, 2Dout)

    return {
        "w1": w1.astype(jnp.bfloat16), "b1": b1,
        "w2": w2.astype(jnp.bfloat16), "b2": b2,
        "w3": w3.astype(jnp.bfloat16), "b3": b3,
        "input_size": input_size, "cat_size": cat_size,
    }


def init_twin_params(seed, input_size, cat_size, hidden_layers, output_size):
    """Deterministic init (uniform, PyTorch-Linear-like fan-in scaling).

    Returns (raw_per_twin_f32_params, packed_kernel_params).
    """
    assert len(hidden_layers) == 2, "this script specializes to 2 hidden layers"
    Din = input_size + cat_size
    H1, H2 = hidden_layers
    Dout = output_size
    key = jax.random.PRNGKey(seed)
    ks = jax.random.split(key, 12)

    def uni(k, shape, fan_in):
        bound = 1.0 / jnp.sqrt(jnp.float32(fan_in))
        return jax.random.uniform(k, shape, jnp.float32, -bound, bound)

    raw = {
        "w1_a": uni(ks[0], (Din, H1), Din), "b1_a": uni(ks[1], (H1,), Din),
        "w2_a": uni(ks[2], (H1, H2), H1),   "b2_a": uni(ks[3], (H2,), H1),
        "w3_a": uni(ks[4], (H2, Dout), H2), "b3_a": uni(ks[5], (Dout,), H2),
        "w1_b": uni(ks[6], (Din, H1), Din), "b1_b": uni(ks[7], (H1,), Din),
        "w2_b": uni(ks[8], (H1, H2), H1),   "b2_b": uni(ks[9], (H2,), H1),
        "w3_b": uni(ks[10], (H2, Dout), H2), "b3_b": uni(ks[11], (Dout,), H2),
    }
    return raw, pack_twin_params(raw, input_size, cat_size)


# ------------------------------- reference --------------------------------

def _reference_forward(x, action, raw):
    """Pure-JAX per-twin reference with matching numerics (bf16 ops, f32 acc)."""
    xin = x if action is None else jnp.concatenate([x, action], axis=-1)

    def one(t):
        w1, b1 = raw[f"w1_{t}"], raw[f"b1_{t}"]
        w2, b2 = raw[f"w2_{t}"], raw[f"b2_{t}"]
        w3, b3 = raw[f"w3_{t}"], raw[f"b3_{t}"]
        h1 = jnp.maximum(
            jnp.dot(xin.astype(jnp.bfloat16), w1.astype(jnp.bfloat16),
                    preferred_element_type=jnp.float32) + b1, 0.0)
        h2 = jnp.maximum(
            jnp.dot(h1.astype(jnp.bfloat16), w2.astype(jnp.bfloat16),
                    preferred_element_type=jnp.float32) + b2, 0.0)
        return jnp.dot(h2.astype(jnp.bfloat16), w3.astype(jnp.bfloat16),
                       preferred_element_type=jnp.float32) + b3

    return one("a"), one("b")


# --------------------------------- main -----------------------------------

if __name__ == "__main__":
    input_size = 8
    cat_size = 4
    hidden_layers = [256, 256]
    output_size = 1
    seed = 1234

    raw, params = init_twin_params(seed, input_size, cat_size, hidden_layers,
                                   output_size)
    fwd = jax.jit(functools.partial(twin_forward, params=params))

    key = jax.random.PRNGKey(0)
    # B=2 exercises the single-tile path; B=256 exercises the batched grid
    # (two batch tiles of 128, "parallel" semantics -> both TCs on v7x).
    for B in (2, 256):
        key, kx, ka = jax.random.split(key, 3)
        x = jax.random.normal(kx, (B, input_size), jnp.float32)
        action = jax.random.normal(ka, (B, cat_size), jnp.float32)

        a_out, b_out = fwd(x, action)
        jax.block_until_ready((a_out, b_out))

        a_ref, b_ref = _reference_forward(x, action, raw)
        assert a_out.shape == (B, output_size)
        assert b_out.shape == (B, output_size)
        assert jnp.allclose(a_out, a_ref, atol=5e-3, rtol=5e-3)
        assert jnp.allclose(b_out, b_ref, atol=5e-3, rtol=5e-3)

    print("KERNEL_OK")
</pallas_src>

<mosaic_0001>
module attributes {stable_mosaic.version = 11 : i64} {
  func.func @_twin_kernel_with_action(%arg0: i32, %arg1: memref<2x8xf32, #tpu.memory_space<vmem>>, %arg2: memref<2x4xf32, #tpu.memory_space<vmem>>, %arg3: memref<12x512xbf16, #tpu.memory_space<vmem>>, %arg4: memref<1x512xf32, #tpu.memory_space<vmem>>, %arg5: memref<512x512xbf16, #tpu.memory_space<vmem>>, %arg6: memref<1x512xf32, #tpu.memory_space<vmem>>, %arg7: memref<512x2xbf16, #tpu.memory_space<vmem>>, %arg8: memref<1x2xf32, #tpu.memory_space<vmem>>, %arg9: memref<2x2xf32, #tpu.memory_space<vmem>>) attributes {dimension_semantics = [#tpu.dimension_semantics<parallel>], iteration_bounds = array<i64: 1>, scalar_prefetch = 0 : i64, scratch_operands = 0 : i64, tpu.core_type = #tpu.core_type<tc>, window_params = [{transform_indices = @transform_0, window_bounds = array<i64: 2, 8>}, {transform_indices = @transform_1, window_bounds = array<i64: 2, 4>}, {pipeline_mode = #tpu.pipeline_mode<synchronous>, transform_indices = @transform_2, window_bounds = array<i64: 12, 512>}, {pipeline_mode = #tpu.pipeline_mode<synchronous>, transform_indices = @transform_3, window_bounds = array<i64: 1, 512>}, {pipeline_mode = #tpu.pipeline_mode<synchronous>, transform_indices = @transform_4, window_bounds = array<i64: 512, 512>}, {pipeline_mode = #tpu.pipeline_mode<synchronous>, transform_indices = @transform_5, window_bounds = array<i64: 1, 512>}, {pipeline_mode = #tpu.pipeline_mode<synchronous>, transform_indices = @transform_6, window_bounds = array<i64: 512, 2>}, {pipeline_mode = #tpu.pipeline_mode<synchronous>, transform_indices = @transform_7, window_bounds = array<i64: 1, 2>}, {transform_indices = @transform_8, window_bounds = array<i64: 2, 2>}]} {
    %c0 = arith.constant 0 : index
    %c0_0 = arith.constant 0 : index
    %0 = vector.load %arg1[%c0, %c0_0] : memref<2x8xf32, #tpu.memory_space<vmem>>, vector<2x8xf32>
    %c0_1 = arith.constant 0 : index
    %c0_2 = arith.constant 0 : index
    %1 = vector.load %arg2[%c0_1, %c0_2] : memref<2x4xf32, #tpu.memory_space<vmem>>, vector<2x4xf32>
    %2 = tpu.concatenate %0, %1 in 1 : vector<2x8xf32>, vector<2x4xf32> -> vector<2x12xf32>
    %3 = arith.truncf %2 : vector<2x12xf32> to vector<2x12xbf16>
    %c0_3 = arith.constant 0 : index
    %c0_4 = arith.constant 0 : index
    %4 = vector.load %arg3[%c0_3, %c0_4] : memref<12x512xbf16, #tpu.memory_space<vmem>>, vector<12x512xbf16>
    %cst = arith.constant dense<0.000000e+00> : vector<2x512xf32>
    %5 = tpu.matmul %3, %4, %cst {dimension_numbers = #tpu.dot_dimension_numbers<[1], [0], [0], [1], [0, 0, 1, 1], [], []>} : vector<2x12xbf16>, vector<12x512xbf16>, vector<2x512xf32> -> vector<2x512xf32>
    %c0_5 = arith.constant 0 : index
    %c0_6 = arith.constant 0 : index
    %6 = vector.load %arg4[%c0_5, %c0_6] : memref<1x512xf32, #tpu.memory_space<vmem>>, vector<1x512xf32>
    %7 = vector.broadcast %6 : vector<1x512xf32> to vector<2x512xf32>
    %8 = arith.addf %5, %7 : vector<2x512xf32>
    %cst_7 = arith.constant 0.000000e+00 : f32
    %9 = vector.broadcast %cst_7 : f32 to vector<2x512xf32>
    %10 = arith.maximumf %8, %9 : vector<2x512xf32>
    %11 = arith.truncf %10 : vector<2x512xf32> to vector<2x512xbf16>
    %c0_8 = arith.constant 0 : index
    %c0_9 = arith.constant 0 : index
    %12 = vector.load %arg5[%c0_8, %c0_9] : memref<512x512xbf16, #tpu.memory_space<vmem>>, vector<512x512xbf16>
    %cst_10 = arith.constant dense<0.000000e+00> : vector<2x512xf32>
    %13 = tpu.matmul %11, %12, %cst_10 {dimension_numbers = #tpu.dot_dimension_numbers<[1], [0], [0], [1], [0, 0, 1, 1], [], []>} : vector<2x512xbf16>, vector<512x512xbf16>, vector<2x512xf32> -> vector<2x512xf32>
    %c0_11 = arith.constant 0 : index
    %c0_12 = arith.constant 0 : index
    %14 = vector.load %arg6[%c0_11, %c0_12] : memref<1x512xf32, #tpu.memory_space<vmem>>, vector<1x512xf32>
    %15 = vector.broadcast %14 : vector<1x512xf32> to vector<2x512xf32>
    %16 = arith.addf %13, %15 : vector<2x512xf32>
    %cst_13 = arith.constant 0.000000e+00 : f32
    %17 = vector.broadcast %cst_13 : f32 to vector<2x512xf32>
    %18 = arith.maximumf %16, %17 : vector<2x512xf32>
    %19 = arith.truncf %18 : vector<2x512xf32> to vector<2x512xbf16>
    %c0_14 = arith.constant 0 : index
    %c0_15 = arith.constant 0 : index
    %20 = vector.load %arg7[%c0_14, %c0_15] : memref<512x2xbf16, #tpu.memory_space<vmem>>, vector<512x2xbf16>
    %cst_16 = arith.constant dense<0.000000e+00> : vector<2x2xf32>
    %21 = tpu.matmul %19, %20, %cst_16 {dimension_numbers = #tpu.dot_dimension_numbers<[1], [0], [0], [1], [0, 0, 1, 1], [], []>} : vector<2x512xbf16>, vector<512x2xbf16>, vector<2x2xf32> -> vector<2x2xf32>
    %c0_17 = arith.constant 0 : index
    %c0_18 = arith.constant 0 : index
    %22 = vector.load %arg8[%c0_17, %c0_18] : memref<1x2xf32, #tpu.memory_space<vmem>>, vector<1x2xf32>
    %23 = vector.broadcast %22 : vector<1x2xf32> to vector<2x2xf32>
    %24 = arith.addf %21, %23 : vector<2x2xf32>
    %c0_19 = arith.constant 0 : index
    %c0_20 = arith.constant 0 : index
    %25 = vector.load %arg9[%c0_19, %c0_20] : memref<2x2xf32, #tpu.memory_space<vmem>>, vector<2x2xf32>
    tpu.vector_store %arg9[%c0_19, %c0_20], %24 {strides = array<i32>} : memref<2x2xf32, #tpu.memory_space<vmem>>, vector<2x2xf32>,
    return
  }
  func.func @transform_0(%arg0: i32) -> (i32, i32) {
    %c0_i32 = arith.constant 0 : i32
    %c0_i32_0 = arith.constant 0 : i32
    return %arg0, %c0_i32 : i32, i32
  }
  func.func @transform_1(%arg0: i32) -> (i32, i32) {
    %c0_i32 = arith.constant 0 : i32
    %c0_i32_0 = arith.constant 0 : i32
    return %arg0, %c0_i32 : i32, i32
  }
  func.func @transform_2(%arg0: i32) -> (i32, i32) {
    %c0_i32 = arith.constant 0 : i32
    %c0_i32_0 = arith.constant 0 : i32
    %c0_i32_1 = arith.constant 0 : i32
    return %c0_i32, %c0_i32_0 : i32, i32
  }
  func.func @transform_3(%arg0: i32) -> (i32, i32) {
    %c0_i32 = arith.constant 0 : i32
    %c0_i32_0 = arith.constant 0 : i32
    %c0_i32_1 = arith.constant 0 : i32
    return %c0_i32, %c0_i32_0 : i32, i32
  }
  func.func @transform_4(%arg0: i32) -> (i32, i32) {
    %c0_i32 = arith.constant 0 : i32
    %c0_i32_0 = arith.constant 0 : i32
    %c0_i32_1 = arith.constant 0 : i32
    return %c0_i32, %c0_i32_0 : i32, i32
  }
  func.func @transform_5(%arg0: i32) -> (i32, i32) {
    %c0_i32 = arith.constant 0 : i32
    %c0_i32_0 = arith.constant 0 : i32
    %c0_i32_1 = arith.constant 0 : i32
    return %c0_i32, %c0_i32_0 : i32, i32
  }
  func.func @transform_6(%arg0: i32) -> (i32, i32) {
    %c0_i32 = arith.constant 0 : i32
    %c0_i32_0 = arith.constant 0 : i32
    %c0_i32_1 = arith.constant 0 : i32
    return %c0_i32, %c0_i32_0 : i32, i32
  }
  func.func @transform_7(%arg0: i32) -> (i32, i32) {
    %c0_i32 = arith.constant 0 : i32
    %c0_i32_0 = arith.constant 0 : i32
    %c0_i32_1 = arith.constant 0 : i32
    return %c0_i32, %c0_i32_0 : i32, i32
  }
  func.func @transform_8(%arg0: i32) -> (i32, i32) {
    %c0_i32 = arith.constant 0 : i32
    %c0_i32_0 = arith.constant 0 : i32
    return %arg0, %c0_i32 : i32, i32
  }
}

</mosaic_0001>

<bundles_post_ra>
// kernel: twin_forward.1
= control target key start
LH: loop header
LB: loop body
LE: loop exit
PB: predicated region body
PF: predicated region fallthrough
CT: control target
= control target key end

     0   :  { %13 = vsyncpa [#allocation3], 0  ;;  %s2276_s0 = inlined_call_operand.hbm [shape: f32[2,8], index: 0, kind: input, shape index: {}]   ;;  %s2277_s1 = inlined_call_operand.hbm [shape: f32[2,4], index: 1, kind: input, shape index: {}]   ;;  %s2278_s2 = inlined_call_operand.hbm [shape: bf16[12,512], index: 2, kind: input, shape index: {}]   ;;  %s2279_s3 = inlined_call_operand.hbm [shape: f32[1,512], index: 3, kind: input, shape index: {}]   ;;  %s2280_s4 = inlined_call_operand.hbm [shape: bf16[512,512], index: 4, kind: input, shape index: {}]   ;;  %s2281_s5 = inlined_call_operand.vmem [shape: f32[1,512], index: 5, kind: input, shape index: {}]   ;;  %s2282_s6 = inlined_call_operand.hbm [shape: bf16[512,2], index: 6, kind: input, shape index: {}]   ;;  %s2283_s7 = inlined_call_operand.vmem [shape: f32[1,2], index: 7, kind: input, shape index: {}]   ;;  %s2284_s8 = inlined_call_operand.vmem [shape: f32[2,2], index: 8, kind: output, shape index: {}]  }
   0x1   :  { %14 = vsyncpa [#allocation5], 0 }
   0x2   :  { %15 = vsyncpa [#allocation8], 0 }
   0x3   :  { %16 = vsyncpa [#allocation11], 0  ;;  %s2162_s27 = smov [#allocation4]   ;;  %s2163_s29 = smov [#allocation7]  }
   0x4   :  { %s33_s28 = sshll.u32 %s2162_s27, 4  ;;  %s55_s30 = sshll.u32 %s2163_s29, 4  ;;  %s34_s28 = int_to_ptr.vmem [resolvable:$true] %s33_s28  ;;  %s56_s30 = int_to_ptr.vmem [resolvable:$true] %s55_s30 }
   0x5   :  { %s2042_s9 = scalar_lea.vmem %s34_s28, 32  ;;  %p2047_p1 = scmp.lt.s32.totalorder %s34_s28, %s34_s28 }
   0x6   :  { %p2043_p0 = scmp.ne.s32.totalorder %s34_s28, %s2042_s9  ;;  %p2048_p2 = scmp.lt.s32.totalorder %s2042_s9, %s2042_s9 }
   0x8   :  { %p2049_p3 = por %p2048_p2, %p2047_p1 }
   0xa   :  { %p2050_p4 = pnand %p2049_p3, %p2043_p0 }
   0xc   :  { %2053 = shalt.err (!%p2050_p4)
}
   0xd   :  { %36 = dma.hbm_to_vmem [thread:$0]  %s2277_s1, 32, %s34_s28, [#allocation5]  }
   0xe   :  { %s2062_s12 = scalar_lea.vmem %s56_s30, 64  ;;  %p2067_p6 = scmp.lt.s32.totalorder %s56_s30, %s56_s30 }
   0xf   :  { %p2063_p5 = scmp.ne.s32.totalorder %s56_s30, %s2062_s12  ;;  %p2068_p7 = scmp.lt.s32.totalorder %s2062_s12, %s2062_s12 }
  0x11   :  { %p2069_p8 = por %p2068_p7, %p2067_p6 }
  0x13   :  { %p2070_p9 = pnand %p2069_p8, %p2063_p5 }
  0x15   :  { %2073 = shalt.err (!%p2070_p9)
}
  0x16   :  { %58 = dma.hbm_to_vmem [thread:$0]  %s2279_s3, 64, %s56_s30, [#allocation8]  }
  0x17   :  { %s2164_s15 = smov [#allocation2]   ;;  %s2165_s17 = smov [#allocation6]  }
  0x18   :  { %s23_s16 = sshll.u32 %s2164_s15, 4  ;;  %s42_s18 = sshll.u32 %s2165_s17, 4  ;;  %s24_s16 = int_to_ptr.vmem [resolvable:$true] %s23_s16  ;;  %s43_s18 = int_to_ptr.vmem [resolvable:$true] %s42_s18 }
  0x19   :  { %s2082_s19 = scalar_lea.vmem %s24_s16, 32  ;;  %p2087_p11 = scmp.lt.s32.totalorder %s24_s16, %s24_s16 }
  0x1a   :  { %p2083_p10 = scmp.ne.s32.totalorder %s24_s16, %s2082_s19  ;;  %p2088_p12 = scmp.lt.s32.totalorder %s2082_s19, %s2082_s19 }
  0x1c   :  { %p2089_p13 = por %p2088_p12, %p2087_p11 }
  0x1e   :  { %p2090_p0 = pnand %p2089_p13, %p2083_p10 }
  0x20   :  { %2093 = shalt.err (!%p2090_p0)
}
  0x21   :  { %26 = dma.hbm_to_vmem [thread:$0]  %s2276_s0, 32, %s24_s16, [#allocation3]  }
  0x22   :  { %s2102_s21 = scalar_lea.vmem %s43_s18, 512  ;;  %p2107_p2 = scmp.lt.s32.totalorder %s43_s18, %s43_s18 }
  0x23   :  { %p2103_p1 = scmp.ne.s32.totalorder %s43_s18, %s2102_s21  ;;  %p2108_p3 = scmp.lt.s32.totalorder %s2102_s21, %s2102_s21 }
  0x25   :  { %p2109_p4 = por %p2108_p3, %p2107_p2 }
  0x27   :  { %p2110_p5 = pnand %p2109_p4, %p2103_p1 }
  0x29   :  { %2113 = shalt.err (!%p2110_p5)
}
  0x2a   :  { %s2166_s3 = smov 256   ;;  %s2167_s22 = smov 16  }
  0x2b   :  { %48 = dma.hbm_to_vmem [thread:$0]  %s2278_s2, 512, %s43_s18, [#allocation5], %s2166_s3, %s2166_s3, %s2167_s22  }
  0x2c   :  { %s2168_s25 = smov [#allocation9]   ;;  %s2169_s27 = smov [#allocation10]  }
  0x2d   :  { %s64_s26 = sshll.u32 %s2168_s25, 4  ;;  %s78_s28 = sshll.u32 %s2169_s27, 4  ;;  %s65_s26 = int_to_ptr.vmem [resolvable:$true] %s64_s26  ;;  %s79_s28 = int_to_ptr.vmem [resolvable:$true] %s78_s28 }
  0x2e   :  { %s2122_s0 = scalar_lea.vmem %s65_s26, 16384  ;;  %p2127_p7 = scmp.lt.s32.totalorder %s65_s26, %s65_s26 }
  0x2f   :  { %p2123_p6 = scmp.ne.s32.totalorder %s65_s26, %s2122_s0  ;;  %p2128_p8 = scmp.lt.s32.totalorder %s2122_s0, %s2122_s0 }
  0x31   :  { %p2129_p9 = por %p2128_p8, %p2127_p7 }
  0x33   :  { %p2130_p10 = pnand %p2129_p9, %p2123_p6 }
  0x35   :  { %2133 = shalt.err (!%p2130_p10)
}
  0x36   :  { %70 = dma.hbm_to_vmem [thread:$0]  %s2280_s4, 16384, %s65_s26, [#allocation8], %s2166_s3, %s2166_s3, %s2167_s22  }
  0x37   :  { %s2142_s9 = scalar_lea.vmem %s79_s28, 4096  ;;  %p2147_p12 = scmp.lt.s32.totalorder %s79_s28, %s79_s28 }
  0x38   :  { %p2143_p11 = scmp.ne.s32.totalorder %s79_s28, %s2142_s9  ;;  %p2148_p13 = scmp.lt.s32.totalorder %s2142_s9, %s2142_s9 }
  0x3a   :  { %p2149_p0 = por %p2148_p13, %p2147_p12 }
  0x3c   :  { %p2150_p1 = pnand %p2149_p0, %p2143_p11 }
  0x3e   :  { %2153 = shalt.err (!%p2150_p1)
}
  0x3f   :  { %s2170_s2 = smov 64   ;;  %s2171_s10 = smov 4  }
  0x40   :  { %84 = dma.hbm_to_vmem [thread:$0]  %s2282_s6, 4096, %s79_s28, [#allocation11], %s2170_s2, %s2170_s2, %s2171_s10  }
  0x41   :  { %2154 = dma.done.wait [#allocation3], 32  }
  0x42   :  { %2155 = vsyncadd [#allocation3], 4294967264 }
  0x43   :  { %2156 = dma.done.wait [#allocation5], 544  }
  0x44   :  { %2157 = vsyncadd [#allocation5], 4294966752 }
  0x45   :  { %2158 = dma.done.wait [#allocation8], 16448  }
  0x46   :  { %2159 = vsyncadd [#allocation8], 4294950848 }
  0x47   :  { %2160 = dma.done.wait [#allocation11], 4096  }
  0x48   :  { %2161 = vsyncadd [#allocation11], 4294963200  ;;  %v2172_v0 = vmov 0   ;;  %v107_v1 = vld [vmem:[#allocation4] sm:$0x3]  ;;  %vm161_vm0 = vcmask 1045504  }
  0x49   :  { %206 = vmatprep.mubr.bf16.mxu0 %v2172_v0  ;;  %247 = vmatprep.mubr.bf16.mxu1 %v2172_v0  ;;  %s2173_s4 = smov 8   ;;  %v1804_v2 = vld [vmem:[#allocation6 + $0x4] ss:$16 sps:$4 sm:$0x3f]   ;;  %v1812_v6 = vld [vmem:[#allocation9 + $0xe4] ss:$16 sps:$4 sm:$0xff]  }
  0x4a   :  { %109 = vrot.lane.b32.xlu0 %v107_v1, %s2173_s4  ;;  %v1806_v3 = vld [vmem:[#allocation6 + $0xc] ss:$16 sps:$4 sm:$0x3f]   ;;  %1583 = vmatprep.subr.msk.bf16.mxu0 %vm161_vm0, %v1804_v2  ;;  %v1808_v4 = vld [vmem:[#allocation6] ss:$16 sps:$4 sm:$0x3f]  }
  0x4b   :  { %v1809_v5 = vld [vmem:[#allocation6 + $0x8] ss:$16 sps:$4 sm:$0x3f]   ;;  %1585 = vmatprep.subr.msk.bf16.mxu1 %vm161_vm0, %v1806_v3  ;;  %v163_v7 = vsel %vm161_vm0, %v1808_v4, 0  ;;  %v106_v10 = vld [vmem:[#allocation2] sm:$0x3] }
  0x4c   :  { %v169_v8 = vsel %vm161_vm0, %v1809_v5, 0  ;;  %189 = vmatpush1.bf16.msra.mxu0 %v163_v7  ;;  %v1815_v9 = vld [vmem:[#allocation9 + $0x2e4] ss:$16 sps:$4 sm:$0xff]   ;;  %vm112_vm1 = vcmask 64512   ;;  %vm157_vm2 = vcmask 97280   ;;  %vm1569_vm3 = vcmask 9216  }
  0x4d   :  { %230 = vmatpush1.bf16.msra.mxu1 %v169_v8  ;;  %1054 = vmatprep.subr.bf16.mxu0 %v1812_v6  ;;  %v1810_v13 = vld [vmem:[#allocation9 + $0xe0] ss:$16 sps:$4 sm:$0xff]   ;;  %v1818_v16 = vld [vmem:[#allocation9 + $0xc4] ss:$16 sps:$4 sm:$0xff]  }
  0x4e   :  { %1095 = vmatprep.subr.bf16.mxu1 %v1815_v9  ;;  %v1813_v14 = vld [vmem:[#allocation9 + $0x2e0] ss:$16 sps:$4 sm:$0xff]   ;;  %v1821_v17 = vld [vmem:[#allocation9 + $0x2c4] ss:$16 sps:$4 sm:$0xff]  }
  0x4f   :  { %v1816_v18 = vld [vmem:[#allocation9 + $0xc0] ss:$16 sps:$4 sm:$0xff]   ;;  %v1824_v20 = vld [vmem:[#allocation9 + $0xa4] ss:$16 sps:$4 sm:$0xff]  }
  0x50   :  { %v1819_v19 = vld [vmem:[#allocation9 + $0x2c0] ss:$16 sps:$4 sm:$0xff]   ;;  %v1827_v21 = vld [vmem:[#allocation9 + $0x2a4] ss:$16 sps:$4 sm:$0xff]  }
  0x51   :  { %v1822_v22 = vld [vmem:[#allocation9 + $0xa0] ss:$16 sps:$4 sm:$0xff]   ;;  %v1830_v24 = vld [vmem:[#allocation9 + $0x84] ss:$16 sps:$4 sm:$0xff]  }
  0x52   :  { %v1825_v23 = vld [vmem:[#allocation9 + $0x2a0] ss:$16 sps:$4 sm:$0xff]   ;;  %v1833_v25 = vld [vmem:[#allocation9 + $0x284] ss:$16 sps:$4 sm:$0xff]  }
  0x53   :  { %v1828_v26 = vld [vmem:[#allocation9 + $0x80] ss:$16 sps:$4 sm:$0xff]   ;;  %v1836_v28 = vld [vmem:[#allocation9 + $0x64] ss:$16 sps:$4 sm:$0xff]  }
  0x54   :  { %v1831_v27 = vld [vmem:[#allocation9 + $0x280] ss:$16 sps:$4 sm:$0xff]   ;;  %v1839_v29 = vld [vmem:[#allocation9 + $0x264] ss:$16 sps:$4 sm:$0xff]  }
  0x55   :  { %v1834_v30 = vld [vmem:[#allocation9 + $0x60] ss:$16 sps:$4 sm:$0xff]   ;;  %v1842_v32 = vld [vmem:[#allocation9 + $0x44] ss:$16 sps:$4 sm:$0xff]  }
  0x56   :  { %v1837_v31 = vld [vmem:[#allocation9 + $0x260] ss:$16 sps:$4 sm:$0xff]   ;;  %v1845_v33 = vld [vmem:[#allocation9 + $0x244] ss:$16 sps:$4 sm:$0xff]  }
  0x57   :  { %v1840_v34 = vld [vmem:[#allocation9 + $0x40] ss:$16 sps:$4 sm:$0xff]   ;;  %v1848_v36 = vld [vmem:[#allocation9 + $0x24] ss:$16 sps:$4 sm:$0xff]  }
  0x58   :  { %v1843_v35 = vld [vmem:[#allocation9 + $0x240] ss:$16 sps:$4 sm:$0xff]   ;;  %v1851_v37 = vld [vmem:[#allocation9 + $0x224] ss:$16 sps:$4 sm:$0xff]  }
  0x59   :  { %v1846_v38 = vld [vmem:[#allocation9 + $0x20] ss:$16 sps:$4 sm:$0xff]   ;;  %v1854_v40 = vld [vmem:[#allocation9 + $0x4] ss:$16 sps:$4 sm:$0xff]  }
  0x5a   :  { %v1849_v39 = vld [vmem:[#allocation9 + $0x220] ss:$16 sps:$4 sm:$0xff]   ;;  %v1857_v41 = vld [vmem:[#allocation9 + $0x204] ss:$16 sps:$4 sm:$0xff]  }
  0x5b   :  { %v1852_v42 = vld [vmem:[#allocation9] ss:$16 sps:$4 sm:$0xff]   ;;  %v1860_v44 = vld [vmem:[#allocation9 + $0x1e4] ss:$16 sps:$4 sm:$0xff]  }
  0x5c   :  { %v1855_v43 = vld [vmem:[#allocation9 + $0x200] ss:$16 sps:$4 sm:$0xff]   ;;  %v1863_v45 = vld [vmem:[#allocation9 + $0x3e4] ss:$16 sps:$4 sm:$0xff]  }
  0x5d   :  { %v1858_v46 = vld [vmem:[#allocation9 + $0x1e0] ss:$16 sps:$4 sm:$0xff]   ;;  %v1866_v48 = vld [vmem:[#allocation9 + $0x1c4] ss:$16 sps:$4 sm:$0xff]  }
  0x5e   :  { %v1861_v47 = vld [vmem:[#allocation9 + $0x3e0] ss:$16 sps:$4 sm:$0xff]   ;;  %v1869_v49 = vld [vmem:[#allocation9 + $0x3c4] ss:$16 sps:$4 sm:$0xff]  }
  0x5f   :  { %v1864_v50 = vld [vmem:[#allocation9 + $0x1c0] ss:$16 sps:$4 sm:$0xff]   ;;  %v1872_v52 = vld [vmem:[#allocation9 + $0x1a4] ss:$16 sps:$4 sm:$0xff]  }
  0x60   :  { %v1867_v51 = vld [vmem:[#allocation9 + $0x3c0] ss:$16 sps:$4 sm:$0xff]   ;;  %v1875_v53 = vld [vmem:[#allocation9 + $0x3a4] ss:$16 sps:$4 sm:$0xff]  }
  0x61   :  { %v1870_v54 = vld [vmem:[#allocation9 + $0x1a0] ss:$16 sps:$4 sm:$0xff]   ;;  %v1878_v56 = vld [vmem:[#allocation9 + $0x184] ss:$16 sps:$4 sm:$0xff]  }
  0x62   :  { %v1873_v55 = vld [vmem:[#allocation9 + $0x3a0] ss:$16 sps:$4 sm:$0xff]   ;;  %v1881_v57 = vld [vmem:[#allocation9 + $0x384] ss:$16 sps:$4 sm:$0xff]  }
  0x63   :  { %v1876_v58 = vld [vmem:[#allocation9 + $0x180] ss:$16 sps:$4 sm:$0xff]   ;;  %v1884_v60 = vld [vmem:[#allocation9 + $0x164] ss:$16 sps:$4 sm:$0xff]  }
  0x64   :  { %v1879_v59 = vld [vmem:[#allocation9 + $0x380] ss:$16 sps:$4 sm:$0xff]   ;;  %v1887_v61 = vld [vmem:[#allocation9 + $0x364] ss:$16 sps:$4 sm:$0xff]  }
  0x65   :  { %v1882_v62 = vld [vmem:[#allocation9 + $0x160] ss:$16 sps:$4 sm:$0xff]   ;;  %v1890_v0 = vld [vmem:[#allocation9 + $0x144] ss:$16 sps:$4 sm:$0xff]  }
  0x66   :  { %v1885_v63 = vld [vmem:[#allocation9 + $0x360] ss:$16 sps:$4 sm:$0xff]   ;;  %v1893_v1 = vld [vmem:[#allocation9 + $0x344] ss:$16 sps:$4 sm:$0xff]  }
  0x67   :  { %v1888_v2 = vld [vmem:[#allocation9 + $0x140] ss:$16 sps:$4 sm:$0xff]   ;;  %v1896_v4 = vld [vmem:[#allocation9 + $0x124] ss:$16 sps:$4 sm:$0xff]  }
  0x68   :  { %v1891_v3 = vld [vmem:[#allocation9 + $0x340] ss:$16 sps:$4 sm:$0xff]   ;;  %v1899_v5 = vld [vmem:[#allocation9 + $0x324] ss:$16 sps:$4 sm:$0xff]  }
  0x69   :  { %v1894_v6 = vld [vmem:[#allocation9 + $0x120] ss:$16 sps:$4 sm:$0xff]   ;;  %v1902_v8 = vld [vmem:[#allocation9 + $0x104] ss:$16 sps:$4 sm:$0xff]  }
  0x6a   :  { %v1897_v7 = vld [vmem:[#allocation9 + $0x320] ss:$16 sps:$4 sm:$0xff]   ;;  %v1905_v9 = vld [vmem:[#allocation9 + $0x304] ss:$16 sps:$4 sm:$0xff]  }
  0xbc   :  { %v110_v11 = vpop.permute.xlu0 %109 }
  0xbd   :  { %v113_v12 = vsel %vm112_vm1, %v106_v10, %v110_v11  ;;  %v1900_v10 = vld [vmem:[#allocation9 + $0x100] ss:$16 sps:$4 sm:$0xff]  }
  0xbe   :  { %v114_v15 = vpack.c.bf16 %v113_v12, %v113_v12  ;;  %v1903_v11 = vld [vmem:[#allocation9 + $0x300] ss:$16 sps:$4 sm:$0xff]   ;;  %v1908_v12 = vld [vmem:[#allocation9 + $0xec] ss:$16 sps:$4 sm:$0xff]  }
  0xc0   :  { %1584 = vmatmul.mubr.msk.bf16.vlgmr.msra.gmra.mxu0 %vm157_vm2, %v114_v15  ;;  %1586 = vmatmul.mubr.msk.bf16.vlgmr.msra.gmra.mxu1 %vm157_vm2, %v114_v15 }
  0xc1   :  { %1055 = vmatpush1.bf16.msra.mxu0 %v1810_v13  ;;  %1096 = vmatpush1.bf16.msra.mxu1 %v1813_v14  ;;  %v1911_v13 = vld [vmem:[#allocation9 + $0x2ec] ss:$16 sps:$4 sm:$0xff]   ;;  %v121_v14 = vlaneseq }
  0xc2   :  { %1056 = vmatprep.subr.bf16.mxu0 %v1818_v16  ;;  %1097 = vmatprep.subr.bf16.mxu1 %v1821_v17 }
  0xc3   :  { %v2237_v15 = vshrl.u32 %v121_v14, 7  ;;  %v1957_v14 = vld [vmem:[#allocation9 + $0x3e8] ss:$16 sps:$4 sm:$0xff]  }
  0xc5   :  { %1057 = vmatpush1.bf16.msra.mxu0 %v1816_v18  ;;  %1098 = vmatpush1.bf16.msra.mxu1 %v1819_v19  ;;  %v123_v16 = vsub.s32 0, %v2237_v15  ;;  %v131_v17 = vsub.s32 2, %v2237_v15  ;;  %v119_v18 = vld [vmem:[#allocation7] sm:$0xf]  ;;  %v127_v19 = vsub.s32 1, %v2237_v15 }
  0xc6   :  { %1058 = vmatprep.subr.bf16.mxu0 %v1824_v20  ;;  %1099 = vmatprep.subr.bf16.mxu1 %v1827_v21  ;;  %v135_v20 = vsub.s32 3, %v2237_v15 }
  0xc7   :  { %v124_v21 = vrot.slane %v119_v18, %v123_v16 }
  0xc9   :  { %1059 = vmatpush1.bf16.msra.mxu0 %v1822_v22  ;;  %1100 = vmatpush1.bf16.msra.mxu1 %v1825_v23  ;;  %v132_v22 = vrot.slane %v119_v18, %v131_v17  ;;  %v128_v23 = vrot.slane %v119_v18, %v127_v19 }
  0xca   :  { %1060 = vmatprep.subr.bf16.mxu0 %v1830_v24  ;;  %1101 = vmatprep.subr.bf16.mxu1 %v1833_v25  ;;  %v136_v24 = vrot.slane %v119_v18, %v135_v20  ;;  %v1962_v18 = vld [vmem:[#allocation9 + $0x1cc] ss:$16 sps:$4 sm:$0xff]  }
  0xcd   :  { %1061 = vmatpush1.bf16.msra.mxu0 %v1828_v26  ;;  %1102 = vmatpush1.bf16.msra.mxu1 %v1831_v27 }
  0xce   :  { %1062 = vmatprep.subr.bf16.mxu0 %v1836_v28  ;;  %1103 = vmatprep.subr.bf16.mxu1 %v1839_v29 }
  0xd1   :  { %1063 = vmatpush1.bf16.msra.mxu0 %v1834_v30  ;;  %1104 = vmatpush1.bf16.msra.mxu1 %v1837_v31 }
  0xd2   :  { %1064 = vmatprep.subr.bf16.mxu0 %v1842_v32  ;;  %1105 = vmatprep.subr.bf16.mxu1 %v1845_v33 }
  0xd5   :  { %1065 = vmatpush1.bf16.msra.mxu0 %v1840_v34  ;;  %1106 = vmatpush1.bf16.msra.mxu1 %v1843_v35 }
  0xd6   :  { %1066 = vmatprep.subr.bf16.mxu0 %v1848_v36  ;;  %1107 = vmatprep.subr.bf16.mxu1 %v1851_v37 }
  0xd9   :  { %1067 = vmatpush1.bf16.msra.mxu0 %v1846_v38  ;;  %1108 = vmatpush1.bf16.msra.mxu1 %v1849_v39 }
  0xda   :  { %1068 = vmatprep.subr.bf16.mxu0 %v1854_v40  ;;  %1109 = vmatprep.subr.bf16.mxu1 %v1857_v41 }
  0xdd   :  { %1069 = vmatpush1.bf16.msra.mxu0 %v1852_v42  ;;  %1110 = vmatpush1.bf16.msra.mxu1 %v1855_v43  ;;  %v1906_v43 = vld [vmem:[#allocation9 + $0xe8] ss:$16 sps:$4 sm:$0xff]  }
  0xde   :  { %1070 = vmatprep.subr.bf16.mxu0 %v1860_v44  ;;  %1111 = vmatprep.subr.bf16.mxu1 %v1863_v45  ;;  %v1909_v44 = vld [vmem:[#allocation9 + $0x2e8] ss:$16 sps:$4 sm:$0xff]  }
  0xe1   :  { %1071 = vmatpush2.bf16.msra.mxu0 %v1858_v46  ;;  %1112 = vmatpush2.bf16.msra.mxu1 %v1861_v47  ;;  %v1914_v47 = vld [vmem:[#allocation9 + $0xcc] ss:$16 sps:$4 sm:$0xff]  }
  0xe2   :  { %1072 = vmatprep.subr.bf16.mxu0 %v1866_v48  ;;  %1113 = vmatprep.subr.bf16.mxu1 %v1869_v49  ;;  %v1917_v48 = vld [vmem:[#allocation9 + $0x2cc] ss:$16 sps:$4 sm:$0xff]   ;;  %v1912_v49 = vld [vmem:[#allocation9 + $0xc8] ss:$16 sps:$4 sm:$0xff]  }
  0xe5   :  { %1073 = vmatpush2.bf16.msra.mxu0 %v1864_v50  ;;  %1114 = vmatpush2.bf16.msra.mxu1 %v1867_v51  ;;  %v1915_v50 = vld [vmem:[#allocation9 + $0x2c8] ss:$16 sps:$4 sm:$0xff]   ;;  %v1920_v51 = vld [vmem:[#allocation9 + $0xac] ss:$16 sps:$4 sm:$0xff]  }
  0xe6   :  { %1074 = vmatprep.subr.bf16.mxu0 %v1872_v52  ;;  %1115 = vmatprep.subr.bf16.mxu1 %v1875_v53  ;;  %v1923_v52 = vld [vmem:[#allocation9 + $0x2ac] ss:$16 sps:$4 sm:$0xff]   ;;  %v1918_v53 = vld [vmem:[#allocation9 + $0xa8] ss:$16 sps:$4 sm:$0xff]  }
  0xe9   :  { %1075 = vmatpush2.bf16.msra.mxu0 %v1870_v54  ;;  %1116 = vmatpush2.bf16.msra.mxu1 %v1873_v55  ;;  %v1921_v54 = vld [vmem:[#allocation9 + $0x2a8] ss:$16 sps:$4 sm:$0xff]   ;;  %v1926_v55 = vld [vmem:[#allocation9 + $0x8c] ss:$16 sps:$4 sm:$0xff]  }
  0xea   :  { %1076 = vmatprep.subr.bf16.mxu0 %v1878_v56  ;;  %1117 = vmatprep.subr.bf16.mxu1 %v1881_v57  ;;  %v1929_v56 = vld [vmem:[#allocation9 + $0x28c] ss:$16 sps:$4 sm:$0xff]   ;;  %v1924_v57 = vld [vmem:[#allocation9 + $0x88] ss:$16 sps:$4 sm:$0xff]  }
  0xed   :  { %1077 = vmatpush2.bf16.msra.mxu0 %v1876_v58  ;;  %1118 = vmatpush2.bf16.msra.mxu1 %v1879_v59  ;;  %v1927_v58 = vld [vmem:[#allocation9 + $0x288] ss:$16 sps:$4 sm:$0xff]   ;;  %v1932_v59 = vld [vmem:[#allocation9 + $0x6c] ss:$16 sps:$4 sm:$0xff]  }
  0xee   :  { %1078 = vmatprep.subr.bf16.mxu0 %v1884_v60  ;;  %1119 = vmatprep.subr.bf16.mxu1 %v1887_v61  ;;  %v1935_v60 = vld [vmem:[#allocation9 + $0x26c] ss:$16 sps:$4 sm:$0xff]   ;;  %v1930_v61 = vld [vmem:[#allocation9 + $0x68] ss:$16 sps:$4 sm:$0xff]  }
  0xf1   :  { %1079 = vmatpush2.bf16.msra.mxu0 %v1882_v62  ;;  %1120 = vmatpush2.bf16.msra.mxu1 %v1885_v63  ;;  %v1933_v62 = vld [vmem:[#allocation9 + $0x268] ss:$16 sps:$4 sm:$0xff]   ;;  %v1938_v63 = vld [vmem:[#allocation9 + $0x4c] ss:$16 sps:$4 sm:$0xff]  }
  0xf2   :  { %1080 = vmatprep.subr.bf16.mxu0 %v1890_v0  ;;  %1121 = vmatprep.subr.bf16.mxu1 %v1893_v1  ;;  %v1941_v0 = vld [vmem:[#allocation9 + $0x24c] ss:$16 sps:$4 sm:$0xff]   ;;  %v1936_v1 = vld [vmem:[#allocation9 + $0x48] ss:$16 sps:$4 sm:$0xff]  }
  0xf5   :  { %1081 = vmatpush2.bf16.msra.mxu0 %v1888_v2  ;;  %1122 = vmatpush2.bf16.msra.mxu1 %v1891_v3  ;;  %v1939_v2 = vld [vmem:[#allocation9 + $0x248] ss:$16 sps:$4 sm:$0xff]   ;;  %v1944_v3 = vld [vmem:[#allocation9 + $0x2c] ss:$16 sps:$4 sm:$0xff]  }
  0xf6   :  { %1082 = vmatprep.subr.bf16.mxu0 %v1896_v4  ;;  %1123 = vmatprep.subr.bf16.mxu1 %v1899_v5  ;;  %v1947_v4 = vld [vmem:[#allocation9 + $0x22c] ss:$16 sps:$4 sm:$0xff]   ;;  %v1942_v5 = vld [vmem:[#allocation9 + $0x28] ss:$16 sps:$4 sm:$0xff]  }
  0xf9   :  { %1083 = vmatpush2.bf16.msra.mxu0 %v1894_v6  ;;  %1124 = vmatpush2.bf16.msra.mxu1 %v1897_v7  ;;  %v1945_v6 = vld [vmem:[#allocation9 + $0x228] ss:$16 sps:$4 sm:$0xff]   ;;  %v1950_v7 = vld [vmem:[#allocation9 + $0xc] ss:$16 sps:$4 sm:$0xff]  }
  0xfa   :  { %1084 = vmatprep.subr.bf16.mxu0 %v1902_v8  ;;  %1125 = vmatprep.subr.bf16.mxu1 %v1905_v9  ;;  %v1953_v8 = vld [vmem:[#allocation9 + $0x20c] ss:$16 sps:$4 sm:$0xff]   ;;  %v1948_v9 = vld [vmem:[#allocation9 + $0x8] ss:$16 sps:$4 sm:$0xff]  }
  0xfd   :  { %1085 = vmatpush2.bf16.msra.mxu0 %v1900_v10  ;;  %1126 = vmatpush2.bf16.msra.mxu1 %v1903_v11  ;;  %v1951_v10 = vld [vmem:[#allocation9 + $0x208] ss:$16 sps:$4 sm:$0xff]   ;;  %v1956_v11 = vld [vmem:[#allocation9 + $0x1ec] ss:$16 sps:$4 sm:$0xff]  }
  0xfe   :  { %1136 = vmatprep.subr.bf16.mxu0 %v1908_v12  ;;  %1177 = vmatprep.subr.bf16.mxu1 %v1911_v13  ;;  %v1959_v12 = vld [vmem:[#allocation9 + $0x3ec] ss:$16 sps:$4 sm:$0xff]   ;;  %v1954_v13 = vld [vmem:[#allocation9 + $0x1e8] ss:$16 sps:$4 sm:$0xff]  }
 0x180   :  { %v208_v25 = vpop.f32.mrf.mxu0  ;;  %v249_v26 = vpop.f32.mrf.mxu1 }
 0x181   :  { %v209_v27 = vadd.f32 %v208_v25, %v124_v21  ;;  %v250_v28 = vadd.f32 %v249_v26, %v132_v22  ;;  %v1965_v21 = vld [vmem:[#allocation9 + $0x3cc] ss:$16 sps:$4 sm:$0xff]   ;;  %v1960_v22 = vld [vmem:[#allocation9 + $0x1c8] ss:$16 sps:$4 sm:$0xff]  }
 0x182   :  { %v210_v29 = vpop.f32.mrf.mxu0  ;;  %v251_v30 = vpop.f32.mrf.mxu1  ;;  %v1971_v25 = vld [vmem:[#allocation9 + $0x3ac] ss:$16 sps:$4 sm:$0xff]   ;;  %v1966_v26 = vld [vmem:[#allocation9 + $0x1a8] ss:$16 sps:$4 sm:$0xff]  }
 0x183   :  { %v211_v31 = vadd.f32 %v210_v29, %v128_v23  ;;  %v252_v32 = vadd.f32 %v251_v30, %v136_v24  ;;  %v256_v33 = vmax.f32 %v209_v27, 0.0  ;;  %v258_v34 = vmax.f32 %v250_v28, 0.0  ;;  %v1963_v23 = vld [vmem:[#allocation9 + $0x3c8] ss:$16 sps:$4 sm:$0xff]   ;;  %v1968_v24 = vld [vmem:[#allocation9 + $0x1ac] ss:$16 sps:$4 sm:$0xff]  }
 0x184   :  { %v212_v35 = vpop.f32.mrf.mxu0  ;;  %v253_v36 = vpop.f32.mrf.mxu1  ;;  %v1969_v27 = vld [vmem:[#allocation9 + $0x3a8] ss:$16 sps:$4 sm:$0xff]   ;;  %v1974_v28 = vld [vmem:[#allocation9 + $0x18c] ss:$16 sps:$4 sm:$0xff]  }
 0x185   :  { %v257_v37 = vmax.f32 %v211_v31, 0.0  ;;  %v259_v38 = vmax.f32 %v252_v32, 0.0  ;;  %v2251_v45 = vpack.c.bf16 %v256_v33, %v256_v33  ;;  %v2253_v46 = vpack.c.bf16 %v258_v34, %v258_v34  ;;  %v1977_v29 = vld [vmem:[#allocation9 + $0x38c] ss:$16 sps:$4 sm:$0xff]   ;;  %v1972_v30 = vld [vmem:[#allocation9 + $0x188] ss:$16 sps:$4 sm:$0xff]  }
 0x186   :  { %v213_v39 = vpop.f32.mrf.mxu0  ;;  %v254_v40 = vpop.f32.mrf.mxu1  ;;  %v1975_v31 = vld [vmem:[#allocation9 + $0x388] ss:$16 sps:$4 sm:$0xff]   ;;  %v1980_v32 = vld [vmem:[#allocation9 + $0x16c] ss:$16 sps:$4 sm:$0xff]  }
 0x187   :  { %v261_v41 = vpack.c.bf16 %v257_v37, %v257_v37  ;;  %v263_v42 = vpack.c.bf16 %v259_v38, %v259_v38  ;;  %v1983_v33 = vld [vmem:[#allocation9 + $0x36c] ss:$16 sps:$4 sm:$0xff]   ;;  %v1978_v34 = vld [vmem:[#allocation9 + $0x168] ss:$16 sps:$4 sm:$0xff]  }
 0x188   :  { %v1981_v35 = vld [vmem:[#allocation9 + $0x368] ss:$16 sps:$4 sm:$0xff]   ;;  %v1986_v36 = vld [vmem:[#allocation9 + $0x14c] ss:$16 sps:$4 sm:$0xff]  }
 0x189   :  { %1086 = vmatprep.mubr.bf16.mxu0 %v261_v41  ;;  %1127 = vmatprep.mubr.bf16.mxu1 %v263_v42  ;;  %v1989_v37 = vld [vmem:[#allocation9 + $0x34c] ss:$16 sps:$4 sm:$0xff]   ;;  %v1984_v38 = vld [vmem:[#allocation9 + $0x148] ss:$16 sps:$4 sm:$0xff]  }
 0x18a   :  { %1087 = vmatmul.mubr.bf16.vlgmr.msra.gmra.mxu0 %v2251_v45  ;;  %1128 = vmatmul.mubr.bf16.vlgmr.msra.gmra.mxu1 %v2253_v46  ;;  %v1987_v39 = vld [vmem:[#allocation9 + $0x348] ss:$16 sps:$4 sm:$0xff]   ;;  %v1992_v40 = vld [vmem:[#allocation9 + $0x12c] ss:$16 sps:$4 sm:$0xff]  }
 0x18b   :  { %1137 = vmatpush1.bf16.msra.mxu0 %v1906_v43  ;;  %1178 = vmatpush1.bf16.msra.mxu1 %v1909_v44  ;;  %v1993_v43 = vld [vmem:[#allocation9 + $0x328] ss:$16 sps:$4 sm:$0xff]   ;;  %v1998_v44 = vld [vmem:[#allocation9 + $0x10c] ss:$16 sps:$4 sm:$0xff]  }
 0x18c   :  { %1168 = vmatprep.mubr.bf16.mxu0 %v261_v41  ;;  %1209 = vmatprep.mubr.bf16.mxu1 %v263_v42  ;;  %v1995_v41 = vld [vmem:[#allocation9 + $0x32c] ss:$16 sps:$4 sm:$0xff]   ;;  %v1990_v42 = vld [vmem:[#allocation9 + $0x128] ss:$16 sps:$4 sm:$0xff]  }
 0x18d   :  { %1138 = vmatprep.subr.bf16.mxu0 %v1914_v47  ;;  %1179 = vmatprep.subr.bf16.mxu1 %v1917_v48  ;;  %v2001_v47 = vld [vmem:[#allocation9 + $0x30c] ss:$16 sps:$4 sm:$0xff]   ;;  %v1996_v48 = vld [vmem:[#allocation9 + $0x108] ss:$16 sps:$4 sm:$0xff]  }
 0x18f   :  { %1139 = vmatpush1.bf16.msra.mxu0 %v1912_v49  ;;  %1180 = vmatpush1.bf16.msra.mxu1 %v1915_v50  ;;  %v1999_v49 = vld [vmem:[#allocation9 + $0x308] ss:$16 sps:$4 sm:$0xff]  }
 0x190   :  { %1140 = vmatprep.subr.bf16.mxu0 %v1920_v51  ;;  %1181 = vmatprep.subr.bf16.mxu1 %v1923_v52  ;;  %v2002_v50 = vld [vmem:[#allocation10 + $0x78] sm:$0xff]   ;;  %v2004_v52 = vld [vmem:[#allocation10 + $0x70] sm:$0xff]  }
 0x191   :  { %v2003_v51 = vld [vmem:[#allocation10 + $0x38] sm:$0xff]  }
 0x193   :  { %1141 = vmatpush1.bf16.msra.mxu0 %v1918_v53  ;;  %1182 = vmatpush1.bf16.msra.mxu1 %v1921_v54  ;;  %v2005_v53 = vld [vmem:[#allocation10 + $0x30] sm:$0xff]   ;;  %v2006_v54 = vld [vmem:[#allocation10 + $0x68] sm:$0xff]  }
 0x194   :  { %1142 = vmatprep.subr.bf16.mxu0 %v1926_v55  ;;  %1183 = vmatprep.subr.bf16.mxu1 %v1929_v56  ;;  %v2007_v55 = vld [vmem:[#allocation10 + $0x28] sm:$0xff]   ;;  %v2008_v56 = vld [vmem:[#allocation10 + $0x60] sm:$0xff]  }
 0x197   :  { %1143 = vmatpush1.bf16.msra.mxu0 %v1924_v57  ;;  %1184 = vmatpush1.bf16.msra.mxu1 %v1927_v58  ;;  %v2009_v57 = vld [vmem:[#allocation10 + $0x20] sm:$0xff]   ;;  %v2010_v58 = vld [vmem:[#allocation10 + $0x58] sm:$0xff]  }
 0x198   :  { %1144 = vmatprep.subr.bf16.mxu0 %v1932_v59  ;;  %1185 = vmatprep.subr.bf16.mxu1 %v1935_v60  ;;  %v2018_v59 = vld [vmem:[#allocation10 + $0xf8] sm:$0xff]  }
 0x199   :  { %v2019_v60 = vld [vmem:[#allocation10 + $0xb8] sm:$0xff]  }
 0x19b   :  { %1145 = vmatpush1.bf16.msra.mxu0 %v1930_v61  ;;  %1186 = vmatpush1.bf16.msra.mxu1 %v1933_v62  ;;  %v2020_v61 = vld [vmem:[#allocation10 + $0xf0] sm:$0xff]   ;;  %v2011_v62 = vld [vmem:[#allocation10 + $0x18] sm:$0xff]  }
 0x19c   :  { %1146 = vmatprep.subr.bf16.mxu0 %v1938_v63  ;;  %1187 = vmatprep.subr.bf16.mxu1 %v1941_v0  ;;  %v2022_v63 = vld [vmem:[#allocation10 + $0xe8] sm:$0xff]   ;;  %v2013_v0 = vld [vmem:[#allocation10 + $0x10] sm:$0xff]  }
 0x19f   :  { %1147 = vmatpush1.bf16.msra.mxu0 %v1936_v1  ;;  %1188 = vmatpush1.bf16.msra.mxu1 %v1939_v2  ;;  %v2014_v1 = vld [vmem:[#allocation10 + $0x48] sm:$0xff]  }
 0x1a0   :  { %1148 = vmatprep.subr.bf16.mxu0 %v1944_v3  ;;  %1189 = vmatprep.subr.bf16.mxu1 %v1947_v4  ;;  %v2023_v2 = vld [vmem:[#allocation10 + $0xa8] sm:$0xff]   ;;  %v2024_v3 = vld [vmem:[#allocation10 + $0xe0] sm:$0xff]  }
 0x1a1   :  { %v2015_v4 = vld [vmem:[#allocation10 + $0x8] sm:$0xff]  }
 0x1a3   :  { %1149 = vmatpush1.bf16.msra.mxu0 %v1942_v5  ;;  %1190 = vmatpush1.bf16.msra.mxu1 %v1945_v6  ;;  %v2016_v5 = vld [vmem:[#allocation10 + $0x40] sm:$0xff]  }
 0x1a4   :  { %1150 = vmatprep.subr.bf16.mxu0 %v1950_v7  ;;  %1191 = vmatprep.subr.bf16.mxu1 %v1953_v8  ;;  %v2025_v6 = vld [vmem:[#allocation10 + $0xa0] sm:$0xff]   ;;  %v2026_v7 = vld [vmem:[#allocation10 + $0xd8] sm:$0xff]  }
 0x1a5   :  { %v2017_v8 = vld [vmem:[#allocation10] sm:$0xff]  }
 0x1a7   :  { %1151 = vmatpush1.bf16.msra.mxu0 %v1948_v9  ;;  %1192 = vmatpush1.bf16.msra.mxu1 %v1951_v10  ;;  %v2027_v9 = vld [vmem:[#allocation10 + $0x98] sm:$0xff]   ;;  %v2028_v10 = vld [vmem:[#allocation10 + $0xd0] sm:$0xff]  }
 0x1a8   :  { %1152 = vmatprep.subr.bf16.mxu0 %v1956_v11  ;;  %1193 = vmatprep.subr.bf16.mxu1 %v1959_v12  ;;  %v2029_v11 = vld [vmem:[#allocation10 + $0x90] sm:$0xff]   ;;  %v2030_v12 = vld [vmem:[#allocation10 + $0xc8] sm:$0xff]  }
 0x1ab   :  { %1153 = vmatpush2.bf16.msra.mxu0 %v1954_v13  ;;  %1194 = vmatpush2.bf16.msra.mxu1 %v1957_v14  ;;  %v2031_v13 = vld [vmem:[#allocation10 + $0x88] sm:$0xff]   ;;  %v2032_v14 = vld [vmem:[#allocation10 + $0xc0] sm:$0xff]  }
 0x1ac   :  { %1154 = vmatprep.subr.bf16.mxu0 %v1962_v18  ;;  %1195 = vmatprep.subr.bf16.mxu1 %v1965_v21  ;;  %v2033_v18 = vld [vmem:[#allocation10 + $0x80] sm:$0xff]   ;;  %v392_v21 = vld [vmem:[%s2281_s5] sm:$0xf] }
 0x1af   :  { %1155 = vmatpush2.bf16.msra.mxu0 %v1960_v22  ;;  %1196 = vmatpush2.bf16.msra.mxu1 %v1963_v23  ;;  %v397_v22 = vrot.slane %v392_v21, %v123_v16  ;;  %v401_v23 = vrot.slane %v392_v21, %v127_v19  ;;  %v405_v16 = vrot.slane %v392_v21, %v131_v17 }
 0x1b0   :  { %1156 = vmatprep.subr.bf16.mxu0 %v1968_v24  ;;  %1197 = vmatprep.subr.bf16.mxu1 %v1971_v25  ;;  %v409_v19 = vrot.slane %v392_v21, %v135_v20 }
 0x1b3   :  { %1157 = vmatpush2.bf16.msra.mxu0 %v1966_v26  ;;  %1198 = vmatpush2.bf16.msra.mxu1 %v1969_v27 }
 0x1b4   :  { %1158 = vmatprep.subr.bf16.mxu0 %v1974_v28  ;;  %1199 = vmatprep.subr.bf16.mxu1 %v1977_v29 }
 0x1b7   :  { %1159 = vmatpush2.bf16.msra.mxu0 %v1972_v30  ;;  %1200 = vmatpush2.bf16.msra.mxu1 %v1975_v31 }
 0x1b8   :  { %1160 = vmatprep.subr.bf16.mxu0 %v1980_v32  ;;  %1201 = vmatprep.subr.bf16.mxu1 %v1983_v33 }
 0x1bb   :  { %1161 = vmatpush2.bf16.msra.mxu0 %v1978_v34  ;;  %1202 = vmatpush2.bf16.msra.mxu1 %v1981_v35 }
 0x1bc   :  { %1162 = vmatprep.subr.bf16.mxu0 %v1986_v36  ;;  %1203 = vmatprep.subr.bf16.mxu1 %v1989_v37 }
 0x1bf   :  { %1163 = vmatpush2.bf16.msra.mxu0 %v1984_v38  ;;  %1204 = vmatpush2.bf16.msra.mxu1 %v1987_v39 }
 0x1c0   :  { %1164 = vmatprep.subr.bf16.mxu0 %v1992_v40  ;;  %1205 = vmatprep.subr.bf16.mxu1 %v1995_v41 }
 0x1c3   :  { %1165 = vmatpush2.bf16.msra.mxu0 %v1990_v42  ;;  %1206 = vmatpush2.bf16.msra.mxu1 %v1993_v43 }
 0x1c4   :  { %1166 = vmatprep.subr.bf16.mxu0 %v1998_v44  ;;  %1207 = vmatprep.subr.bf16.mxu1 %v2001_v47 }
 0x1c7   :  { %1167 = vmatpush2.bf16.msra.mxu0 %v1996_v48  ;;  %1208 = vmatpush2.bf16.msra.mxu1 %v1999_v49 }
 0x1c8   :  { %1748 = vmatprep.subr.bf16.mxu0 %v2002_v50  ;;  %1770 = vmatprep.subr.bf16.mxu1 %v2018_v59 }
 0x1ca   :  { %1169 = vmatmul.mubr.bf16.vlgmr.msra.gmra.mxu0 %v2251_v45  ;;  %1210 = vmatmul.mubr.bf16.vlgmr.msra.gmra.mxu1 %v2253_v46  ;;  %v2012_v45 = vld [vmem:[#allocation10 + $0x50] sm:$0xff]  }
 0x1cb   :  { %1749 = vmatpush3.bf16.msra.mxu0 %v2003_v51  ;;  %1771 = vmatpush3.bf16.msra.mxu1 %v2019_v60  ;;  %v2021_v46 = vld [vmem:[#allocation10 + $0xb0] sm:$0xff]   ;;  %v1715_v60 = vld [vmem:[%s2283_s7] ss:$0 sm:$0xff] }
 0x1cc   :  { %1750 = vmatprep.subr.bf16.mxu0 %v2004_v52  ;;  %1772 = vmatprep.subr.bf16.mxu1 %v2020_v61 }
 0x1cf   :  { %1751 = vmatpush3.bf16.msra.mxu0 %v2005_v53  ;;  %1773 = vmatpush3.bf16.msra.mxu1 %v2021_v46 }
 0x1d0   :  { %1752 = vmatprep.subr.bf16.mxu0 %v2006_v54  ;;  %1774 = vmatprep.subr.bf16.mxu1 %v2022_v63 }
 0x1d3   :  { %1753 = vmatpush3.bf16.msra.mxu0 %v2007_v55  ;;  %1775 = vmatpush3.bf16.msra.mxu1 %v2023_v2 }
 0x1d4   :  { %1754 = vmatprep.subr.bf16.mxu0 %v2008_v56  ;;  %1776 = vmatprep.subr.bf16.mxu1 %v2024_v3 }
 0x1d7   :  { %1755 = vmatpush3.bf16.msra.mxu0 %v2009_v57  ;;  %1777 = vmatpush3.bf16.msra.mxu1 %v2025_v6 }
 0x1d8   :  { %1756 = vmatprep.subr.bf16.mxu0 %v2010_v58  ;;  %1778 = vmatprep.subr.bf16.mxu1 %v2026_v7 }
 0x1db   :  { %1757 = vmatpush3.bf16.msra.mxu0 %v2011_v62  ;;  %1779 = vmatpush3.bf16.msra.mxu1 %v2027_v9 }
 0x1dc   :  { %1758 = vmatprep.subr.bf16.mxu0 %v2012_v45  ;;  %1780 = vmatprep.subr.bf16.mxu1 %v2028_v10 }
 0x1df   :  { %1759 = vmatpush3.bf16.msra.mxu0 %v2013_v0  ;;  %1781 = vmatpush3.bf16.msra.mxu1 %v2029_v11 }
 0x1e0   :  { %1760 = vmatprep.subr.bf16.mxu0 %v2014_v1  ;;  %1782 = vmatprep.subr.bf16.mxu1 %v2030_v12 }
 0x1e3   :  { %1761 = vmatpush3.bf16.msra.mxu0 %v2015_v4  ;;  %1783 = vmatpush3.bf16.msra.mxu1 %v2031_v13 }
 0x1e4   :  { %1762 = vmatprep.subr.bf16.mxu0 %v2016_v5  ;;  %1784 = vmatprep.subr.bf16.mxu1 %v2032_v14 }
 0x1e7   :  { %1763 = vmatpush3.bf16.msra.mxu0 %v2017_v8  ;;  %1785 = vmatpush3.bf16.msra.mxu1 %v2033_v18 }
 0x24a   :  { %v1088_v24 = vpop.f32.mrf.mxu0  ;;  %v1129_v25 = vpop.f32.mrf.mxu1 }
 0x24b   :  { %v1089_v26 = vadd.f32 %v1088_v24, %v397_v22 }
 0x24c   :  { %v1090_v27 = vpop.f32.mrf.mxu0  ;;  %v1131_v28 = vpop.f32.mrf.mxu1 }
 0x24d   :  { %v1130_v29 = vadd.f32 %v1129_v25, %v1089_v26  ;;  %v1091_v30 = vadd.f32 %v1090_v27, %v401_v23 }
 0x24e   :  { %v1092_v31 = vpop.f32.mrf.mxu0  ;;  %v1133_v32 = vpop.f32.mrf.mxu1 }
 0x24f   :  { %v1132_v33 = vadd.f32 %v1131_v28, %v1091_v30  ;;  %v1218_v34 = vmax.f32 %v1130_v29, 0.0 }
 0x250   :  { %v1093_v35 = vpop.f32.mrf.mxu0  ;;  %v1134_v36 = vpop.f32.mrf.mxu1 }
 0x251   :  { %v1219_v37 = vmax.f32 %v1132_v33, 0.0  ;;  %v1222_v39 = vpack.c.bf16 %v1218_v34, %v1218_v34 }
 0x253   :  { %v1223_v38 = vpack.c.bf16 %v1219_v37, %v1219_v37 }
 0x255   :  { %1521 = vmatprep.mubr.bf16.mxu0 %v1223_v38 }
 0x256   :  { %1522 = vmatmul.mubr.bf16.vlgmr.msra.gmra.mxu0 %v1222_v39 }
 0x28a   :  { %v1170_v40 = vpop.f32.mrf.mxu0  ;;  %v1211_v41 = vpop.f32.mrf.mxu1 }
 0x28b   :  { %v1171_v42 = vadd.f32 %v1170_v40, %v405_v16 }
 0x28c   :  { %v1172_v43 = vpop.f32.mrf.mxu0  ;;  %v1213_v44 = vpop.f32.mrf.mxu1 }
 0x28d   :  { %v1212_v47 = vadd.f32 %v1211_v41, %v1171_v42  ;;  %v1173_v48 = vadd.f32 %v1172_v43, %v409_v19 }
 0x28e   :  { %v1174_v49 = vpop.f32.mrf.mxu0  ;;  %v1215_v50 = vpop.f32.mrf.mxu1 }
 0x28f   :  { %v1214_v51 = vadd.f32 %v1213_v44, %v1173_v48  ;;  %v1220_v52 = vmax.f32 %v1212_v47, 0.0 }
 0x290   :  { %v1175_v53 = vpop.f32.mrf.mxu0  ;;  %v1216_v54 = vpop.f32.mrf.mxu1 }
 0x291   :  { %v1221_v55 = vmax.f32 %v1214_v51, 0.0  ;;  %v1224_v57 = vpack.c.bf16 %v1220_v52, %v1220_v52 }
 0x293   :  { %v1225_v56 = vpack.c.bf16 %v1221_v55, %v1221_v55 }
 0x295   :  { %1561 = vmatprep.mubr.bf16.mxu1 %v1225_v56 }
 0x296   :  { %1562 = vmatmul.mubr.bf16.vlgmr.msra.gmra.mxu1 %v1224_v57 }
 0x316   :  { %v1764_v15 = vpop.f32.mrf.mxu0 }
 0x318   :  { %v1765_v17 = vpop.f32.mrf.mxu0 }
 0x319   :  { %v1766_v59 = vadd.f32 %v1765_v17, %v1764_v15 }
 0x31a   :  { %v1767_v20 = vpop.f32.mrf.mxu0 }
 0x31b   :  { %v1524_v45 = vadd.f32 %v1766_v59, %v1715_v60 }
 0x31c   :  { %v1768_v58 = vpop.f32.mrf.mxu0 }
 0x356   :  { %v1786_v61 = vpop.f32.mrf.mxu1 }
 0x358   :  { %v1787_v62 = vpop.f32.mrf.mxu1 }
 0x359   :  { %v1788_v46 = vadd.f32 %v1787_v62, %v1786_v61 }
 0x35a   :  { %v1789_v63 = vpop.f32.mrf.mxu1 }
 0x35b   :  { %v1564_v0 = vadd.f32 %v1788_v46, %v1524_v45 }
 0x35c   :  { %v1790_v1 = vpop.f32.mrf.mxu1 }
 0x35d   :  { %1570 = vst.msk [vmem:[%s2284_s8] sm:$0x3] %vm1569_vm3, %v1564_v0 }
 0x35e   :  { %1575 = vsyncpa [#allocation3], 1 }
 0x35f   :  { %1576 = vsyncpa [#allocation5], 1 }
 0x360   :  { %1577 = vsyncpa [#allocation8], 1 }
 0x361   :  { %1578 = vsyncpa [#allocation11], 1 }

</bundles_post_ra>
